<compile_context>
chip_gen: v6e
topology: v6e:2x2x1
jax: 0.10.0
libtpu: 0.0.40
codegen_flags: <defaults>
</compile_context>

<pallas_src>
import math
from functools import partial

import numpy as np
import jax
import jax.numpy as jnp
from jax import lax
from jax.experimental import pallas as pl
from jax.experimental.pallas import tpu as pltpu


# ----------------------------------------------------------------------------
# 2D sin-cos positional embedding (same as MAE reference implementation)
# ----------------------------------------------------------------------------
def _get_1d_sincos(embed_dim, pos):
    omega = np.arange(embed_dim // 2, dtype=np.float32)
    omega /= embed_dim / 2.0
    omega = 1.0 / (10000.0 ** omega)
    pos = pos.reshape(-1)
    out = np.einsum("m,d->md", pos, omega)
    return np.concatenate([np.sin(out), np.cos(out)], axis=1)


def get_2d_sincos_pos_embed(embed_dim, grid_size, cls_token=False):
    grid_h = np.arange(grid_size, dtype=np.float32)
    grid_w = np.arange(grid_size, dtype=np.float32)
    grid = np.meshgrid(grid_w, grid_h)  # w first
    grid = np.stack(grid, axis=0).reshape([2, 1, grid_size, grid_size])
    emb_h = _get_1d_sincos(embed_dim // 2, grid[0])
    emb_w = _get_1d_sincos(embed_dim // 2, grid[1])
    pos = np.concatenate([emb_h, emb_w], axis=1)
    if cls_token:
        pos = np.concatenate([np.zeros([1, embed_dim], np.float32), pos], axis=0)
    return pos.astype(np.float32)


def _round_up(x, m):
    return ((x + m - 1) // m) * m


def _vmem_limit_bytes():
    # generation-dependent VMEM budget: ~75% of physical, capped at 100 MiB.
    # v7x (64 MiB) -> 48 MiB, v5e/v6e (128 MiB) -> 96 MiB.
    try:
        info = pltpu.get_tpu_info()
        cap = int(getattr(info, "vmem_capacity_bytes"))
        return min(100 << 20, max(32 << 20, int(cap * 0.75)))
    except Exception:
        return 48 << 20


# ----------------------------------------------------------------------------
# Pallas kernels
# ----------------------------------------------------------------------------
def _ln(x, w, b, eps=1e-6):
    mu = jnp.mean(x, axis=-1, keepdims=True)
    var = jnp.mean((x - mu) ** 2, axis=-1, keepdims=True)
    return (x - mu) * lax.rsqrt(var + eps) * w + b


def patch_embed_kernel(p_ref, w_ref, b_ref, pos_ref, o_ref):
    # p_ref: (nb, Lp, CPP) bf16   w_ref: (CPP, D) bf16
    # b_ref: (1, D) f32           pos_ref: (Lp, D) f32 (resident, read once)
    nb, Lp, CPP = p_ref.shape
    D = w_ref.shape[1]
    p = p_ref[...].reshape(nb * Lp, CPP)
    y = jnp.dot(p, w_ref[...], preferred_element_type=jnp.float32)
    y = y.reshape(nb, Lp, D) + b_ref[...][None] + pos_ref[...][None]
    o_ref[...] = y


def vit_stack_kernel(x_ref, ln1w, ln1b, qkvw, qkvb, projw, projb,
                     ln2w, ln2b, fc1w, fc1b, fc2w, fc2b, nw, nb,
                     o_ref, act_ref, attn_ref,
                     *, num_heads, s_valid, mlp_chunk):
    li = pl.program_id(1)
    n_layers = pl.num_programs(1)
    Bt, S, D = x_ref.shape
    hd = D // num_heads
    scale = 1.0 / math.sqrt(hd)
    R = Bt * S

    # load residual stream into the persistent VMEM scratch at layer 0
    @pl.when(li == 0)
    def _():
        act_ref[...] = x_ref[...].reshape(R, D)

    x = act_ref[...]                                          # (R, D) f32

    # ---- attention branch: x + Proj(Attn(LN1(x))) ----
    h = _ln(x, ln1w[...], ln1b[...])
    qkv = jnp.dot(h.astype(jnp.bfloat16), qkvw[...],
                  preferred_element_type=jnp.float32) + qkvb[...]
    # cast q/k/v to bf16 once (not per head)
    q = qkv[:, 0 * D:1 * D].reshape(Bt, S, D).astype(jnp.bfloat16)
    k = qkv[:, 1 * D:2 * D].reshape(Bt, S, D).astype(jnp.bfloat16)
    v = qkv[:, 2 * D:3 * D].reshape(Bt, S, D).astype(jnp.bfloat16)

    if s_valid < S:  # mask padded key columns (sequence padded to mult of 16)
        col = lax.broadcasted_iota(jnp.int32, (1, S, S), 2)
        key_mask = col < s_valid
    else:
        key_mask = None

    # per-head batched 3D einsums; head outputs scattered into VMEM scratch
    # (no list + concatenate -> no lane-copy traffic / vreg spills)
    for hi in range(num_heads):
        sl = slice(hi * hd, (hi + 1) * hd)
        qh, kh, vh = q[:, :, sl], k[:, :, sl], v[:, :, sl]
        sc = jnp.einsum('bqd,bkd->bqk', qh, kh,
                        preferred_element_type=jnp.float32) * scale
        if key_mask is not None:
            sc = jnp.where(key_mask, sc, -1e30)
        sc = sc - jnp.max(sc, axis=-1, keepdims=True)
        e = jnp.exp(sc)
        inv = pl.reciprocal(jnp.sum(e, axis=-1, keepdims=True), approx=True)
        p = (e * inv).astype(jnp.bfloat16)
        attn_ref[:, :, sl] = jnp.einsum('bqk,bkd->bqd', p, vh,
                                        preferred_element_type=jnp.float32)

    attn = attn_ref[...].reshape(R, D)
    attn = jnp.dot(attn.astype(jnp.bfloat16), projw[...],
                   preferred_element_type=jnp.float32) + projb[...]
    x = x + attn

    # ---- MLP branch: x + FC2(GELU(FC1(LN2(x)))) with hidden chunking ----
    h2 = _ln(x, ln2w[...], ln2b[...]).astype(jnp.bfloat16)
    hidden = fc1w.shape[1]
    acc = jnp.zeros((R, D), jnp.float32)
    for c0 in range(0, hidden, mlp_chunk):
        c1 = min(c0 + mlp_chunk, hidden)
        m = jnp.dot(h2, fc1w[:, c0:c1],
                    preferred_element_type=jnp.float32) + fc1b[:, c0:c1]
        # tanh GELU (EUP transcendental) -- slight deviation from erf GELU.
        m = jax.nn.gelu(m, approximate=True)
        acc = acc + jnp.dot(m.astype(jnp.bfloat16), fc2w[c0:c1, :],
                            preferred_element_type=jnp.float32)
    x = x + acc + fc2b[...]

    act_ref[...] = x

    # ---- final encoder LayerNorm fused into the last depth step ----
    @pl.when(li == n_layers - 1)
    def _():
        y = _ln(x, nw[...], nb[...])
        o_ref[...] = y.reshape(Bt, S, D)


# ----------------------------------------------------------------------------
# Pallas wrappers
# ----------------------------------------------------------------------------
def patch_embed_pallas(patches, w, b, pos, *, vmem_limit):
    # patches: (B, Lp, CPP) bf16   w: (CPP, D) bf16   b: (1, D)   pos: (Lp, D)
    B, Lp, CPP = patches.shape
    D = w.shape[1]
    nb = max(1, 512 // Lp)          # pack images so each step sees >=512 rows
    nb = min(nb, B)
    b_pad = _round_up(B, nb)
    if b_pad != B:
        patches = jnp.pad(patches, ((0, b_pad - B), (0, 0), (0, 0)))

    cost = pl.CostEstimate(
        flops=int(2 * b_pad * Lp * CPP * D),
        transcendentals=0,
        bytes_accessed=int(b_pad * Lp * CPP * 2 + CPP * D * 2
                           + b_pad * Lp * D * 4 + Lp * D * 4))

    out = pl.pallas_call(
        patch_embed_kernel,
        out_shape=jax.ShapeDtypeStruct((b_pad, Lp, D), jnp.float32),
        grid=(b_pad // nb,),
        in_specs=[
            pl.BlockSpec((nb, Lp, CPP), lambda i: (i, 0, 0)),
            pl.BlockSpec((CPP, D), lambda i: (0, 0)),
            pl.BlockSpec((1, D), lambda i: (0, 0)),
            pl.BlockSpec((Lp, D), lambda i: (0, 0)),   # resident, no B-dup
        ],
        out_specs=pl.BlockSpec((nb, Lp, D), lambda i: (i, 0, 0)),
        compiler_params=pltpu.CompilerParams(
            dimension_semantics=("parallel",),
            vmem_limit_bytes=vmem_limit),
        cost_estimate=cost,
    )(patches, w, b, pos)
    return out[:B]


def vit_blocks_pallas(x, blk, norm_w, norm_b, *, num_heads, s_valid,
                      batch_tile, vmem_limit):
    # x: (B_pad, S_pad, D) with B_pad % batch_tile == 0 and S_pad % 16 == 0
    B, S, D = x.shape
    assert B % batch_tile == 0
    depth = blk["qkv_w"].shape[0]
    hidden = blk["fc1_w"].shape[2]
    mlp_chunk = min(hidden, 2048)

    names = ("ln1_w", "ln1_b", "qkv_w", "qkv_b", "proj_w", "proj_b",
             "ln2_w", "ln2_b", "fc1_w", "fc1_b", "fc2_w", "fc2_b")
    stacked = [blk[n] for n in names]

    def layer_spec(arr):
        rest = tuple(arr.shape[1:])
        nrest = len(rest)
        # leading depth dim squeezed; index_map walks the depth grid axis
        return pl.BlockSpec((None,) + rest,
                            lambda bi, li, _n=nrest: (li,) + (0,) * _n)

    in_specs = [pl.BlockSpec((batch_tile, S, D), lambda bi, li: (bi, 0, 0))]
    in_specs += [layer_spec(a) for a in stacked]
    in_specs += [pl.BlockSpec((1, D), lambda bi, li: (0, 0)),
                 pl.BlockSpec((1, D), lambda bi, li: (0, 0))]

    wbytes = sum(int(np.prod(a.shape)) * a.dtype.itemsize for a in stacked)
    cost = pl.CostEstimate(
        flops=int(depth * B * S * (2 * D * (4 * D + 2 * hidden) + 4 * S * D)),
        transcendentals=int(depth * B * S * (S + hidden)),
        bytes_accessed=int(2 * B * S * D * 4 + wbytes))

    return pl.pallas_call(
        partial(vit_stack_kernel, num_heads=num_heads, s_valid=s_valid,
                mlp_chunk=mlp_chunk),
        out_shape=jax.ShapeDtypeStruct((B, S, D), jnp.float32),
        grid=(B // batch_tile, depth),
        in_specs=in_specs,
        out_specs=pl.BlockSpec((batch_tile, S, D), lambda bi, li: (bi, 0, 0)),
        scratch_shapes=[pltpu.VMEM((batch_tile * S, D), jnp.float32),   # residual
                        pltpu.VMEM((batch_tile, S, D), jnp.float32)],   # attn heads
        compiler_params=pltpu.CompilerParams(
            dimension_semantics=("parallel", "arbitrary"),
            vmem_limit_bytes=vmem_limit),
        cost_estimate=cost,
    )(x, *stacked, norm_w, norm_b)


# ----------------------------------------------------------------------------
# Model (parameter init + forward)
# ----------------------------------------------------------------------------
def xavier_uniform(key, shape, fan_in, fan_out):
    bound = math.sqrt(6.0 / (fan_in + fan_out))
    return jax.random.uniform(key, shape, jnp.float32, -bound, bound)


def init_params(key, *, img_size, patch_size, in_chans, embed_dim, depth,
                num_heads, mlp_ratio):
    grid = img_size // patch_size
    num_patches = grid * grid
    cpp = in_chans * patch_size * patch_size
    hidden = int(embed_dim * mlp_ratio)

    keys = jax.random.split(key, 2 + depth)
    ki = iter(keys)

    params = {}
    # patch embed (Conv2d as matmul): weight stored as (C*P*P, D), bf16
    params["pe_w"] = xavier_uniform(next(ki), (cpp, embed_dim),
                                    cpp, embed_dim).astype(jnp.bfloat16)
    params["pe_b"] = jnp.zeros((1, embed_dim), jnp.float32)
    params["cls_token"] = 0.02 * jax.random.normal(next(ki), (1, 1, embed_dim),
                                                   jnp.float32)
    pos = get_2d_sincos_pos_embed(embed_dim, grid, cls_token=True)
    params["pos_embed"] = jnp.asarray(pos)[None]               # (1, L+1, D)
    lp = _round_up(num_patches, 8)
    pos_patch = np.zeros((lp, embed_dim), np.float32)
    pos_patch[:num_patches] = pos[1:]
    params["pos_patch"] = jnp.asarray(pos_patch)               # (Lp, D)

    qkv_ws, proj_ws, fc1_ws, fc2_ws = [], [], [], []
    for _ in range(depth):
        k1, k2, k3, k4 = jax.random.split(next(ki), 4)
        qkv_ws.append(xavier_uniform(k1, (embed_dim, 3 * embed_dim),
                                     embed_dim, 3 * embed_dim))
        proj_ws.append(xavier_uniform(k2, (embed_dim, embed_dim),
                                      embed_dim, embed_dim))
        fc1_ws.append(xavier_uniform(k3, (embed_dim, hidden),
                                     embed_dim, hidden))
        fc2_ws.append(xavier_uniform(k4, (hidden, embed_dim),
                                     hidden, embed_dim))
    params["blk"] = dict(
        ln1_w=jnp.ones((depth, 1, embed_dim), jnp.float32),
        ln1_b=jnp.zeros((depth, 1, embed_dim), jnp.float32),
        qkv_w=jnp.stack(qkv_ws).astype(jnp.bfloat16),
        qkv_b=jnp.zeros((depth, 1, 3 * embed_dim), jnp.float32),
        proj_w=jnp.stack(proj_ws).astype(jnp.bfloat16),
        proj_b=jnp.zeros((depth, 1, embed_dim), jnp.float32),
        ln2_w=jnp.ones((depth, 1, embed_dim), jnp.float32),
        ln2_b=jnp.zeros((depth, 1, embed_dim), jnp.float32),
        fc1_w=jnp.stack(fc1_ws).astype(jnp.bfloat16),
        fc1_b=jnp.zeros((depth, 1, hidden), jnp.float32),
        fc2_w=jnp.stack(fc2_ws).astype(jnp.bfloat16),
        fc2_b=jnp.zeros((depth, 1, embed_dim), jnp.float32),
    )
    params["norm_w"] = jnp.ones((1, embed_dim), jnp.float32)
    params["norm_b"] = jnp.zeros((1, embed_dim), jnp.float32)
    params["num_patches"] = num_patches
    params["patch_size"] = patch_size
    params["num_heads"] = num_heads
    return params


def patchify(x, patch_size):
    # x: NCHW -> (B, L, C*P*P) with (c, ph, pw) flattening (matches Conv2d)
    B, C, H, W = x.shape
    P = patch_size
    gh, gw = H // P, W // P
    x = x.reshape(B, C, gh, P, gw, P)
    x = x.transpose(0, 2, 4, 1, 3, 5)          # (B, gh, gw, C, P, P)
    return x.reshape(B, gh * gw, C * P * P)


def random_masking(x, mask_ratio, key):
    # TODO(synk): argsort/gather-based shuffling has no clean Pallas lowering;
    # done in plain JAX (matches torch semantics; noise source differs).
    N, L, D = x.shape
    len_keep = int(L * (1 - mask_ratio))
    noise = jax.random.uniform(key, (N, L), jnp.float32)
    ids_shuffle = jnp.argsort(noise, axis=1)
    ids_restore = jnp.argsort(ids_shuffle, axis=1)
    ids_keep = ids_shuffle[:, :len_keep]
    x_masked = jnp.take_along_axis(x, ids_keep[:, :, None], axis=1)
    mask = jnp.ones((N, L), jnp.float32).at[:, :len_keep].set(0.0)
    mask = jnp.take_along_axis(mask, ids_restore, axis=1)
    return x_masked, mask, ids_restore


def mae_vit_forward(params, x, mask_ratio, mask_key):
    B = x.shape[0]
    P = params["patch_size"]
    D = params["pe_w"].shape[1]
    L = params["num_patches"]
    vmem_limit = _vmem_limit_bytes()

    # patch embed: patches cast to bf16 on host (kernel casts anyway),
    # fused bias + pos-embed add, pos table resident once in VMEM
    patches = patchify(x, P).astype(jnp.bfloat16)           # (B, L, CPP) bf16
    Lp = params["pos_patch"].shape[0]
    if Lp != L:
        patches = jnp.pad(patches, ((0, 0), (0, Lp - L), (0, 0)))
    tokens = patch_embed_pallas(patches, params["pe_w"], params["pe_b"],
                                params["pos_patch"],
                                vmem_limit=vmem_limit)[:, :L, :]   # (B,L,D) f32

    # random masking (plain JAX glue)
    tokens, mask, ids_restore = random_masking(tokens, mask_ratio, mask_key)

    # cls token
    cls = params["cls_token"] + params["pos_embed"][:, :1, :]
    cls = jnp.broadcast_to(cls, (B, 1, D))
    tokens = jnp.concatenate([cls, tokens], axis=1)          # (B, 1+len_keep, D)
    s_valid = tokens.shape[1]

    # pad sequence to a multiple of 16 (bf16 sublane packing) and the batch to
    # a multiple of the batch tile -- once, before the fused layer stack.
    s_pad = _round_up(s_valid, 16)
    bt_base = 16 if vmem_limit >= (80 << 20) else 8          # bigger tiles on v5e/v6e
    bt = max(1, min(bt_base, B))
    b_pad = _round_up(B, bt)
    tokens = jnp.pad(tokens,
                     ((0, b_pad - B), (0, s_pad - s_valid), (0, 0)))

    # depth-fused transformer stack (single pallas_call; residual stream stays
    # in VMEM across layers; final LN fused into the last depth step)
    tokens = vit_blocks_pallas(
        tokens, params["blk"], params["norm_w"], params["norm_b"],
        num_heads=params["num_heads"], s_valid=s_valid,
        batch_tile=bt, vmem_limit=vmem_limit)

    tokens = tokens[:B, :s_valid, :]
    return tokens, mask, ids_restore


# ----------------------------------------------------------------------------
if __name__ == "__main__":
    # small config: img 16x16, patch 4 -> 16 patches, 4 channels, dim 32
    B, C, IMG, P = 2, 4, 16, 4
    EMBED, DEPTH, HEADS, MLP_RATIO = 32, 2, 4, 4.0
    MASK_RATIO = 0.5

    key = jax.random.PRNGKey(0)
    k_param, k_input, k_mask = jax.random.split(key, 3)

    params = init_params(k_param, img_size=IMG, patch_size=P, in_chans=C,
                         embed_dim=EMBED, depth=DEPTH, num_heads=HEADS,
                         mlp_ratio=MLP_RATIO)
    x = jax.random.normal(k_input, (B, C, IMG, IMG), jnp.float32)

    out, mask, ids_restore = mae_vit_forward(params, x, MASK_RATIO, k_mask)
    jax.block_until_ready((out, mask, ids_restore))

    L = params["num_patches"]
    len_keep = int(L * (1 - MASK_RATIO))
    assert out.shape == (B, 1 + len_keep, EMBED)
    assert mask.shape == (B, L)
    assert ids_restore.shape == (B, L)
    assert bool(jnp.all(jnp.isfinite(out)))
    print("KERNEL_OK")
</pallas_src>

<mosaic_0001>
module attributes {stable_mosaic.version = 11 : i64} {
  func.func @patch_embed_kernel(%arg0: i32, %arg1: memref<2x16x64xbf16, #tpu.memory_space<vmem>>, %arg2: memref<64x32xbf16, #tpu.memory_space<vmem>>, %arg3: memref<1x32xf32, #tpu.memory_space<vmem>>, %arg4: memref<16x32xf32, #tpu.memory_space<vmem>>, %arg5: memref<2x16x32xf32, #tpu.memory_space<vmem>>) attributes {dimension_semantics = [#tpu.dimension_semantics<parallel>], iteration_bounds = array<i64: 1>, scalar_prefetch = 0 : i64, scratch_operands = 0 : i64, tpu.core_type = #tpu.core_type<tc>, window_params = [{transform_indices = @transform_0, window_bounds = array<i64: 2, 16, 64>}, {pipeline_mode = #tpu.pipeline_mode<synchronous>, transform_indices = @transform_1, window_bounds = array<i64: 64, 32>}, {pipeline_mode = #tpu.pipeline_mode<synchronous>, transform_indices = @transform_2, window_bounds = array<i64: 1, 32>}, {pipeline_mode = #tpu.pipeline_mode<synchronous>, transform_indices = @transform_3, window_bounds = array<i64: 16, 32>}, {transform_indices = @transform_4, window_bounds = array<i64: 2, 16, 32>}]} {
    %c0 = arith.constant 0 : index
    %c0_0 = arith.constant 0 : index
    %c0_1 = arith.constant 0 : index
    %0 = vector.load %arg1[%c0, %c0_0, %c0_1] : memref<2x16x64xbf16, #tpu.memory_space<vmem>>, vector<2x16x64xbf16>
    %1 = vector.shape_cast %0 : vector<2x16x64xbf16> to vector<32x64xbf16>
    %c0_2 = arith.constant 0 : index
    %c0_3 = arith.constant 0 : index
    %2 = vector.load %arg2[%c0_2, %c0_3] : memref<64x32xbf16, #tpu.memory_space<vmem>>, vector<64x32xbf16>
    %cst = arith.constant dense<0.000000e+00> : vector<32x32xf32>
    %3 = tpu.matmul %1, %2, %cst {dimension_numbers = #tpu.dot_dimension_numbers<[1], [0], [0], [1], [0, 0, 1, 1], [], []>} : vector<32x64xbf16>, vector<64x32xbf16>, vector<32x32xf32> -> vector<32x32xf32>
    %4 = vector.shape_cast %3 : vector<32x32xf32> to vector<2x16x32xf32>
    %c0_4 = arith.constant 0 : index
    %c0_5 = arith.constant 0 : index
    %5 = vector.load %arg3[%c0_4, %c0_5] : memref<1x32xf32, #tpu.memory_space<vmem>>, vector<1x32xf32>
    %6 = vector.shape_cast %5 : vector<1x32xf32> to vector<1x1x32xf32>
    %7 = vector.broadcast %6 : vector<1x1x32xf32> to vector<2x16x32xf32>
    %8 = arith.addf %4, %7 : vector<2x16x32xf32>
    %c0_6 = arith.constant 0 : index
    %c0_7 = arith.constant 0 : index
    %9 = vector.load %arg4[%c0_6, %c0_7] : memref<16x32xf32, #tpu.memory_space<vmem>>, vector<16x32xf32>
    %10 = vector.shape_cast %9 : vector<16x32xf32> to vector<1x16x32xf32>
    %11 = vector.broadcast %10 : vector<1x16x32xf32> to vector<2x16x32xf32>
    %12 = arith.addf %8, %11 : vector<2x16x32xf32>
    %c0_8 = arith.constant 0 : index
    %c0_9 = arith.constant 0 : index
    %c0_10 = arith.constant 0 : index
    %13 = vector.load %arg5[%c0_8, %c0_9, %c0_10] : memref<2x16x32xf32, #tpu.memory_space<vmem>>, vector<2x16x32xf32>
    tpu.vector_store %arg5[%c0_8, %c0_9, %c0_10], %12 {strides = array<i32>} : memref<2x16x32xf32, #tpu.memory_space<vmem>>, vector<2x16x32xf32>,
    return
  }
  func.func @transform_0(%arg0: i32) -> (i32, i32, i32) {
    %c0_i32 = arith.constant 0 : i32
    %c0_i32_0 = arith.constant 0 : i32
    %c0_i32_1 = arith.constant 0 : i32
    return %arg0, %c0_i32, %c0_i32_0 : i32, i32, i32
  }
  func.func @transform_1(%arg0: i32) -> (i32, i32) {
    %c0_i32 = arith.constant 0 : i32
    %c0_i32_0 = arith.constant 0 : i32
    %c0_i32_1 = arith.constant 0 : i32
    return %c0_i32, %c0_i32_0 : i32, i32
  }
  func.func @transform_2(%arg0: i32) -> (i32, i32) {
    %c0_i32 = arith.constant 0 : i32
    %c0_i32_0 = arith.constant 0 : i32
    %c0_i32_1 = arith.constant 0 : i32
    return %c0_i32, %c0_i32_0 : i32, i32
  }
  func.func @transform_3(%arg0: i32) -> (i32, i32) {
    %c0_i32 = arith.constant 0 : i32
    %c0_i32_0 = arith.constant 0 : i32
    %c0_i32_1 = arith.constant 0 : i32
    return %c0_i32, %c0_i32_0 : i32, i32
  }
  func.func @transform_4(%arg0: i32) -> (i32, i32, i32) {
    %c0_i32 = arith.constant 0 : i32
    %c0_i32_0 = arith.constant 0 : i32
    %c0_i32_1 = arith.constant 0 : i32
    return %arg0, %c0_i32, %c0_i32_0 : i32, i32, i32
  }
}

</mosaic_0001>

<bundles_post_ra>
// kernel: tpu_custom_call.1
= control target key start
LH: loop header
LB: loop body
LE: loop exit
PB: predicated region body
PF: predicated region fallthrough
CT: control target
= control target key end

     0   :  { %vm65_vm0 = vcmask 523264   ;;  %s279_s0 = inlined_call_operand.vmem [shape: bf16[2,16,64], index: 0, kind: input, shape index: {}]   ;;  %s280_s1 = inlined_call_operand.vmem [shape: bf16[64,32], index: 1, kind: input, shape index: {}]   ;;  %s281_s2 = inlined_call_operand.vmem [shape: f32[1,32], index: 2, kind: input, shape index: {}]   ;;  %s282_s3 = inlined_call_operand.vmem [shape: f32[16,32], index: 3, kind: input, shape index: {}]   ;;  %s283_s4 = inlined_call_operand.hbm [shape: f32[2,16,32], index: 4, kind: output, shape index: {}]  }
   0x1   :  { %v189_v0 = vld [vmem:[%s280_s1 + $0x18] sm:$0xff]   ;;  %v190_v1 = vld [vmem:[%s280_s1 + $0x10] sm:$0xff]   ;;  %v191_v2 = vld [vmem:[%s280_s1 + $0x8] sm:$0xff]  }
   0x2   :  { %174 = vmatprep.subr.bf16.mxu0 %v189_v0  ;;  %v193_v3 = vld [vmem:[%s279_s0] sm:$0xff]  }
   0x3   :  { %175 = vmatpush3.bf16.msra.mxu0 %v189_v0  ;;  %182 = vmatprep.mubr.msk.bf16.mxu0 %vm65_vm0, %v193_v3 }
   0x4   :  { %176 = vmatprep.subr.bf16.mxu0 %v190_v1 }
   0x5   :  { %9 = vsyncpa [#allocation3], 0  ;;  %v192_v4 = vld [vmem:[%s280_s1] sm:$0xff]   ;;  %v194_v5 = vld [vmem:[%s279_s0 + $0x8] sm:$0xff]   ;;  %vm138_vm1 = vcmask 261120   ;;  %s217_s0 = smov [#allocation2]  }
   0x6   :  { %v167_v6 = vld [vmem:[%s281_s2] ss:$0 sm:$0xff]  ;;  %v133_v14 = vld [vmem:[%s282_s3 + $0x8] sm:$0xff]  ;;  %s148_s2 = sshll.u32 %s217_s0, 4  ;;  %s149_s2 = int_to_ptr.vmem [resolvable:$true] %s148_s2 }
   0x7   :  { %177 = vmatpush3.bf16.msra.mxu0 %v190_v1  ;;  %v132_v8 = vld [vmem:[%s282_s3] sm:$0xff]  ;;  %s195_s6 = scalar_lea.vmem %s149_s2, 512  ;;  %p200_p1 = scmp.lt.s32.totalorder %s149_s2, %s149_s2 }
   0x8   :  { %178 = vmatprep.subr.bf16.mxu0 %v191_v2  ;;  %p196_p0 = scmp.ne.s32.totalorder %s149_s2, %s195_s6  ;;  %p201_p2 = scmp.lt.s32.totalorder %s195_s6, %s195_s6 }
   0xa   :  { %p202_p3 = por %p201_p2, %p200_p1 }
   0xb   :  { %179 = vmatpush3.bf16.msra.mxu0 %v191_v2 }
   0xc   :  { %180 = vmatprep.subr.bf16.mxu0 %v192_v4  ;;  %p203_p4 = pnand %p202_p3, %p196_p0 }
   0xf   :  { %181 = vmatpush3.bf16.msra.mxu0 %v192_v4 }
  0x12   :  { %183 = vmatmul.mubr.msk.bf16.vlgmr.msra.gmra.mxu0 %vm65_vm0, %v194_v5 }
  0xd2   :  { %v184_v7 = vpop.f32.mrf.mxu0 }
  0xd3   :  { %v130_v9 = vadd.f32 %v184_v7, %v167_v6 }
  0xd4   :  { %v106_v10 = vpop.f32.mrf.mxu0 }
  0xd5   :  { %v136_v11 = vadd.f32 %v132_v8, %v130_v9  ;;  %v128_v12 = vadd.f32 %v167_v6, %v106_v10 }
  0xd6   :  { %v185_v13 = vpop.f32.mrf.mxu0 }
  0xd7   :  { %141 = vst.msk [vmem:[#allocation2 + $0x10] sm:$0xff] %vm138_vm1, %v136_v11  ;;  %v134_v15 = vadd.f32 %v132_v8, %v128_v12  ;;  %v131_v16 = vadd.f32 %v185_v13, %v167_v6 }
  0xd8   :  { %v109_v17 = vpop.f32.mrf.mxu0 }
  0xd9   :  { %139 = vst.msk [vmem:[#allocation2] sm:$0xff] %vm138_vm1, %v134_v15  ;;  %v137_v18 = vadd.f32 %v133_v14, %v131_v16  ;;  %v129_v19 = vadd.f32 %v167_v6, %v109_v17 }
  0xdb   :  { %142 = vst.msk [vmem:[#allocation2 + $0x18] sm:$0xff] %vm138_vm1, %v137_v18  ;;  %v135_v20 = vadd.f32 %v133_v14, %v129_v19 }
  0xdd   :  { %140 = vst.msk [vmem:[#allocation2 + $0x8] sm:$0xff] %vm138_vm1, %v135_v20 }
  0xde   :  { %206 = shalt.err (!%p203_p4)
}
  0xdf   :  { %s218_s3 = smov 128   ;;  %s219_s7 = smov 8  }
  0xe0   :  { %154 = dma.vmem_to_hbm [thread:$0]  %s149_s2, 512, %s283_s4, [#allocation3], %s218_s3, %s218_s3, %s219_s7  }
  0xe1   :  { %215 = dma.done.wait [#allocation3], 512  }
  0xe2   :  { %216 = vsyncadd [#allocation3], 4294966784 }
  0xe3   :  { %158 = vsyncpa [#allocation3], 1 }

</bundles_post_ra>
